<compile_context>
chip_gen: v7x
topology: tpu7x:2x2x1
jax: 0.10.0
libtpu: 0.0.40
codegen_flags: <defaults>
</compile_context>

<pallas_src>
import functools

import jax
import jax.numpy as jnp
import numpy as np
from jax.experimental import pallas as pl
from jax.experimental.pallas import tpu as pltpu

LANE = 128
SUBLANE = 8
TILE = SUBLANE * LANE          # 1024 elements
MAX_BLOCK_ROWS = 2048          # (2048,128) f32 block = 1 MiB; ~4.5 MiB VMEM total


def _focal_sigmoid_kernel(*refs, gamma, n_valid, block_rows, use_cw, reduce_out):
    """One (block_rows, 128) tile of the flattened logits/targets.

    refs (in order):
      [w_ref]  : SMEM (2,) f32  -- class weights [w_target0, w_target1] (if use_cw)
      x_ref    : VMEM (block_rows, 128)        -- logits (any float dtype)
      t_ref    : VMEM (block_rows, 128) int8   -- targets in {0, 1}
      out_ref  : VMEM (1, 1, 128) f32 partial sums          (reduce_out=True)
                 VMEM (block_rows, 128) f32 per-elem loss   (reduce_out=False)
    """
    if use_cw:
        w_ref, x_ref, t_ref, out_ref = refs
    else:
        x_ref, t_ref, out_ref = refs

    i = pl.program_id(0)

    x = x_ref[...].astype(jnp.float32)
    t = t_ref[...]

    # Validity from the global flat index (covers tail padding and the ragged
    # last block); no mask stream is read from HBM.
    row = jax.lax.broadcasted_iota(jnp.int32, x.shape, 0) + i * block_rows
    lane = jax.lax.broadcasted_iota(jnp.int32, x.shape, 1)
    valid = (row * LANE + lane) < n_valid

    p = jax.nn.sigmoid(x)
    t_pos = t != 0
    tf = t_pos.astype(jnp.float32)
    # prob = cat(1-p, p)[target]  ->  p_t
    pt = tf * p + (1.0 - tf) * (1.0 - p)
    pt = jnp.clip(pt, 1e-8, 1.0 - 1e-8)

    om = 1.0 - pt
    g = float(gamma)
    if g == 0.0:
        focal = jnp.ones_like(om)
    elif g.is_integer() and 1 <= int(g) <= 8:
        focal = om
        for _ in range(int(g) - 1):
            focal = focal * om
    else:
        # The pt clamp above keeps om >= 1e-8, so this log is safe; keep adjacent.
        focal = jnp.exp(g * jnp.log(om))

    loss = -focal * jnp.log(pt)
    if use_cw:
        loss = loss * jnp.where(t_pos, w_ref[1], w_ref[0])
    loss = jnp.where(valid, loss, 0.0)

    if reduce_out:
        out_ref[0] = jnp.sum(loss, axis=0, keepdims=True)
    else:
        out_ref[...] = loss


def focal_loss_2d(logit, target, class_weight=None, gamma=2.0,
                  size_average=True, loss_type="sigmoid", block_rows=None):
    """JAX/Pallas equivalent of FocalLoss2d.forward (sigmoid path)."""
    if loss_type != "sigmoid":
        # TODO(synk): 'softmax' branch (per-pixel C-way softmax) not implemented;
        # default module config uses 'sigmoid'.
        raise NotImplementedError("only type='sigmoid' is implemented")

    n = int(logit.size)
    x = logit.reshape(-1)                 # keep original dtype; cast in-kernel
    t = target.reshape(-1)
    # {0,1} targets: ship 1 byte/element to the kernel.
    if t.dtype.itemsize > 1 or not jnp.issubdtype(t.dtype, jnp.integer):
        t = t.astype(jnp.int8)

    # Pad only when needed (to a whole number of (8,128) tiles); the kernel's
    # index mask handles both the pad and any ragged last grid block.
    pad = (-n) % TILE
    if pad:
        x = jnp.pad(x, (0, pad))
        t = jnp.pad(t, (0, pad))
    rows = (n + pad) // LANE

    x2 = x.reshape(rows, LANE)
    t2 = t.reshape(rows, LANE)

    br = min(block_rows or MAX_BLOCK_ROWS, rows)
    if br < rows:
        # int8 targets need 32-sublane multiples unless the block spans the
        # whole sublane dimension.
        br = max(32, (br // 32) * 32)
        if br >= rows:
            br = rows
    num_blocks = (rows + br - 1) // br

    use_cw = class_weight is not None

    def idx_in(i, *_):        # prefetch refs (if any) arrive positionally
        return (i, 0)

    tile_spec = pl.BlockSpec((br, LANE), idx_in)
    in_specs = [tile_spec, tile_spec]

    if size_average:
        out_shape = jax.ShapeDtypeStruct((num_blocks, 1, LANE), jnp.float32)
        out_spec = pl.BlockSpec((1, 1, LANE), lambda i, *_: (i, 0, 0))
    else:
        out_shape = jax.ShapeDtypeStruct((rows, LANE), jnp.float32)
        out_spec = pl.BlockSpec((br, LANE), idx_in)

    kernel = functools.partial(
        _focal_sigmoid_kernel, gamma=gamma, n_valid=n, block_rows=br,
        use_cw=use_cw, reduce_out=size_average)

    grid_spec = pltpu.PrefetchScalarGridSpec(
        num_scalar_prefetch=1 if use_cw else 0,
        grid=(num_blocks,),
        in_specs=in_specs,
        out_specs=out_spec,
    )

    call = pl.pallas_call(
        kernel,
        out_shape=out_shape,
        grid_spec=grid_spec,
        compiler_params=pltpu.CompilerParams(
            dimension_semantics=("parallel",)),
    )

    if use_cw:
        cw = jnp.asarray(class_weight, jnp.float32).reshape(-1)
        out = call(cw, x2, t2)
    else:
        out = call(x2, t2)

    if size_average:
        return jnp.sum(out) / jnp.float32(n)
    # Per-element loss, shaped like the reference module's (N, 1) batch_loss.
    return out.reshape(-1)[:n].reshape(-1, 1)


def _reference_focal_loss(logit, target, class_weight=None, gamma=2.0,
                          size_average=True):
    x = logit.reshape(-1).astype(jnp.float32)
    t = target.reshape(-1).astype(jnp.float32)
    p = jax.nn.sigmoid(x)
    pt = t * p + (1.0 - t) * (1.0 - p)
    pt = jnp.clip(pt, 1e-8, 1.0 - 1e-8)
    if class_weight is None:
        cw = jnp.ones_like(pt)
    else:
        cwa = jnp.asarray(class_weight, jnp.float32)
        cw = jnp.where(t > 0.5, cwa[1], cwa[0])
    batch_loss = -cw * (1.0 - pt) ** gamma * jnp.log(pt)
    if size_average:
        return jnp.mean(batch_loss)
    return batch_loss.reshape(-1, 1)


if __name__ == "__main__":
    key = jax.random.PRNGKey(0)
    k_logit, k_tgt, k_logit2, k_tgt2 = jax.random.split(key, 4)

    # NCHW logits with a single channel (sigmoid / binary segmentation setting)
    B, C, H, W = 2, 1, 16, 16
    logit = jax.random.normal(k_logit, (B, C, H, W), dtype=jnp.float32)
    target = jax.random.bernoulli(k_tgt, 0.5, (B, C, H, W)).astype(jnp.int8)

    # 1) default config (gamma=2, size_average=True, no class weights)
    loss = jax.block_until_ready(focal_loss_2d(logit, target))
    ref = _reference_focal_loss(logit, target)
    np.testing.assert_allclose(np.asarray(loss), np.asarray(ref),
                               rtol=1e-5, atol=1e-5)

    # 2) explicit class weights
    cw = [0.25, 0.75]
    loss_w = jax.block_until_ready(focal_loss_2d(logit, target, class_weight=cw))
    ref_w = _reference_focal_loss(logit, target, class_weight=cw)
    np.testing.assert_allclose(np.asarray(loss_w), np.asarray(ref_w),
                               rtol=1e-5, atol=1e-5)

    # 3) size_average=False -> per-element loss vector (N, 1)
    loss_v = jax.block_until_ready(
        focal_loss_2d(logit, target, size_average=False))
    ref_v = _reference_focal_loss(logit, target, size_average=False)
    np.testing.assert_allclose(np.asarray(loss_v), np.asarray(ref_v),
                               rtol=1e-5, atol=1e-6)

    # 4) multi-block grid with a ragged last block (exercises in-kernel masking)
    B2, H2, W2 = 2, 96, 96
    logit2 = jax.random.normal(k_logit2, (B2, 1, H2, W2), dtype=jnp.float32)
    target2 = jax.random.bernoulli(k_tgt2, 0.3, (B2, 1, H2, W2)).astype(jnp.int8)
    loss2 = jax.block_until_ready(focal_loss_2d(logit2, target2, block_rows=64))
    ref2 = _reference_focal_loss(logit2, target2)
    np.testing.assert_allclose(np.asarray(loss2), np.asarray(ref2),
                               rtol=1e-5, atol=1e-5)

    print("KERNEL_OK")
</pallas_src>

<mosaic_0001>
module attributes {stable_mosaic.version = 11 : i64} {
  func.func @_focal_sigmoid_kernel(%arg0: i32, %arg1: memref<8x128xf32, #tpu.memory_space<vmem>>, %arg2: memref<8x128xi8, #tpu.memory_space<vmem>>, %arg3: memref<1x1x128xf32, #tpu.memory_space<vmem>>) attributes {dimension_semantics = [#tpu.dimension_semantics<parallel>], iteration_bounds = array<i64: 1>, scalar_prefetch = 0 : i64, scratch_operands = 0 : i64, tpu.core_type = #tpu.core_type<tc>, window_params = [{transform_indices = @transform_0, window_bounds = array<i64: 8, 128>}, {transform_indices = @transform_1, window_bounds = array<i64: 8, 128>}, {transform_indices = @transform_2, window_bounds = array<i64: 1, 1, 128>}]} {
    %c0 = arith.constant 0 : index
    %c0_0 = arith.constant 0 : index
    %0 = vector.load %arg1[%c0, %c0_0] : memref<8x128xf32, #tpu.memory_space<vmem>>, vector<8x128xf32>
    %c0_1 = arith.constant 0 : index
    %c0_2 = arith.constant 0 : index
    %1 = vector.load %arg2[%c0_1, %c0_2] : memref<8x128xi8, #tpu.memory_space<vmem>>, vector<8x128xi8>
    %2 = tpu.iota {dimensions = array<i32: 0>} : vector<8x128xi32>
    %c8_i32 = arith.constant 8 : i32
    %3 = arith.muli %arg0, %c8_i32 : i32
    %4 = vector.broadcast %3 : i32 to vector<8x128xi32>
    %5 = arith.addi %2, %4 : vector<8x128xi32>
    %6 = tpu.iota {dimensions = array<i32: 1>} : vector<8x128xi32>
    %c128_i32 = arith.constant 128 : i32
    %7 = vector.broadcast %c128_i32 : i32 to vector<8x128xi32>
    %8 = arith.muli %5, %7 : vector<8x128xi32>
    %9 = arith.addi %8, %6 : vector<8x128xi32>
    %c512_i32 = arith.constant 512 : i32
    %10 = vector.broadcast %c512_i32 : i32 to vector<8x128xi32>
    %11 = arith.cmpi slt, %9, %10 : vector<8x128xi32>
    %12 = arith.negf %0 : vector<8x128xf32>
    %13 = math.exp %12 : vector<8x128xf32>
    %cst = arith.constant 1.000000e+00 : f32
    %14 = vector.broadcast %cst : f32 to vector<8x128xf32>
    %15 = arith.addf %14, %13 : vector<8x128xf32>
    %16 = arith.divf %14, %15 : vector<8x128xf32>
    %c0_i8 = arith.constant 0 : i8
    %17 = vector.broadcast %c0_i8 : i8 to vector<8x128xi8>
    %18 = arith.cmpi ne, %1, %17 : vector<8x128xi8>
    %19 = arith.extui %18 : vector<8x128xi1> to vector<8x128xi32>
    %20 = arith.sitofp %19 : vector<8x128xi32> to vector<8x128xf32>
    %21 = arith.mulf %20, %16 : vector<8x128xf32>
    %cst_3 = arith.constant 1.000000e+00 : f32
    %22 = vector.broadcast %cst_3 : f32 to vector<8x128xf32>
    %23 = arith.subf %22, %20 : vector<8x128xf32>
    %cst_4 = arith.constant 1.000000e+00 : f32
    %24 = vector.broadcast %cst_4 : f32 to vector<8x128xf32>
    %25 = arith.subf %24, %16 : vector<8x128xf32>
    %26 = arith.mulf %23, %25 : vector<8x128xf32>
    %27 = arith.addf %21, %26 : vector<8x128xf32>
    %cst_5 = arith.constant 9.99999993E-9 : f32
    %cst_6 = arith.constant 1.000000e+00 : f32
    %28 = vector.broadcast %cst_5 : f32 to vector<8x128xf32>
    %29 = arith.maximumf %28, %27 : vector<8x128xf32>
    %30 = vector.broadcast %cst_6 : f32 to vector<8x128xf32>
    %31 = arith.minimumf %30, %29 : vector<8x128xf32>
    %cst_7 = arith.constant 1.000000e+00 : f32
    %32 = vector.broadcast %cst_7 : f32 to vector<8x128xf32>
    %33 = arith.subf %32, %31 : vector<8x128xf32>
    %34 = arith.mulf %33, %33 : vector<8x128xf32>
    %cst_8 = arith.constant 0.000000e+00 : f32
    %35 = vector.broadcast %cst_8 : f32 to vector<8x128xf32>
    %36 = arith.subf %35, %34 : vector<8x128xf32>
    %37 = math.log %31 : vector<8x128xf32>
    %38 = arith.mulf %36, %37 : vector<8x128xf32>
    %cst_9 = arith.constant 0.000000e+00 : f32
    %39 = vector.broadcast %cst_9 : f32 to vector<8x128xf32>
    %40 = arith.select %11, %38, %39 : vector<8x128xi1>, vector<8x128xf32>
    %cst_10 = arith.constant dense<0.000000e+00> : vector<128xf32>
    %41 = vector.multi_reduction <add>, %40, %cst_10 [0] : vector<8x128xf32> to vector<128xf32>
    %42 = vector.shape_cast %41 : vector<128xf32> to vector<1x128xf32>
    %c0_11 = arith.constant 0 : index
    %c0_12 = arith.constant 0 : index
    %c0_13 = arith.constant 0 : index
    %43 = vector.load %arg3[%c0_11, %c0_12, %c0_13] : memref<1x1x128xf32, #tpu.memory_space<vmem>>, vector<1x1x128xf32>
    %44 = vector.shape_cast %43 : vector<1x1x128xf32> to vector<1x128xf32>
    %45 = vector.shape_cast %42 : vector<1x128xf32> to vector<1x1x128xf32>
    tpu.vector_store %arg3[%c0_11, %c0_12, %c0_13], %45 {strides = array<i32>} : memref<1x1x128xf32, #tpu.memory_space<vmem>>, vector<1x1x128xf32>,
    return
  }
  func.func @transform_0(%arg0: i32) -> (i32, i32) {
    %c0_i32 = arith.constant 0 : i32
    %c0_i32_0 = arith.constant 0 : i32
    return %arg0, %c0_i32 : i32, i32
  }
  func.func @transform_1(%arg0: i32) -> (i32, i32) {
    %c0_i32 = arith.constant 0 : i32
    %c0_i32_0 = arith.constant 0 : i32
    return %arg0, %c0_i32 : i32, i32
  }
  func.func @transform_2(%arg0: i32) -> (i32, i32, i32) {
    %c0_i32 = arith.constant 0 : i32
    %c0_i32_0 = arith.constant 0 : i32
    %c0_i32_1 = arith.constant 0 : i32
    return %arg0, %c0_i32, %c0_i32_0 : i32, i32, i32
  }
}

</mosaic_0001>

<bundles_post_ra>
// kernel: tpu_custom_call.1
= control target key start
LH: loop header
LB: loop body
LE: loop exit
PB: predicated region body
PF: predicated region fallthrough
CT: control target
= control target key end

     0   :  { %7 = vsyncpa [#allocation3], 0  ;;  %s192_s0 = inlined_call_operand.hbm [shape: f32[8,128], index: 0, kind: input, shape index: {}]   ;;  %s193_s1 = inlined_call_operand.vmem [shape: s8[8,128], index: 1, kind: input, shape index: {}]   ;;  %s194_s2 = inlined_call_operand.hbm [shape: f32[1,1,128], index: 2, kind: output, shape index: {}]  }
   0x1   :  { %8 = vsyncpa [#allocation4], 0  ;;  %s146_s9 = smov [#allocation2]   ;;  %s98_s13 = scalar_lea.hbm %s192_s0, 128 }
   0x2   :  { %s15_s10 = sshll.u32 %s146_s9, 4  ;;  %p99_p0 = scmp.ne.s32.totalorder %s192_s0, %s98_s13  ;;  %s16_s10 = int_to_ptr.vmem [resolvable:$true] %s15_s10 }
   0x3   :  { %p102_p1 = scmp.lt.u32.totalorder %s98_s13, %s192_s0 }
   0x5   :  { %p104_p2 = pnand %p102_p1, %p99_p0 }
   0x7   :  { %107 = shalt.err (!%p104_p2)
}
   0x8   :  { %s108_s18 = scalar_lea.vmem %s16_s10, 128  ;;  %p113_p4 = scmp.lt.s32.totalorder %s16_s10, %s16_s10 }
   0x9   :  { %p109_p3 = scmp.ne.s32.totalorder %s16_s10, %s108_s18  ;;  %p114_p5 = scmp.lt.s32.totalorder %s108_s18, %s108_s18 }
   0xb   :  { %p115_p6 = por %p114_p5, %p113_p4 }
   0xd   :  { %p116_p7 = pnand %p115_p6, %p109_p3 }
   0xf   :  { %119 = shalt.err (!%p116_p7)
}
  0x10   :  { %18 = dma.hbm_to_vmem [thread:$0]  %s192_s0, 128, %s16_s10, [#allocation3]  }
  0x11   :  { %142 = dma.done.wait [#allocation3], 128  }
  0x12   :  { %143 = vsyncadd [#allocation3], 4294967168  ;;  %v26_v0 = vld [vmem:[#allocation2] sm:$0xff]  ;;  %v147_v3 = vmov 0   ;;  %v148_v8 = vmov 0.0   ;;  %v28_v16 = vlaneseq  ;;  %s149_s0 = smov [#allocation5]  }
  0x13   :  { %v86_v1 = vmul.f32 -1.442695, %v26_v0  ;;  %v27_v2 = vld [vmem:[%s193_s1] sm:$0x3]  ;;  %s77_s1 = sshll.u32 %s149_s0, 4  ;;  %s78_s1 = int_to_ptr.vmem [resolvable:$true] %s77_s1 }
  0x14   :  { %vm44_vm0 = vnez %v27_v2  ;;  %v29_v19 = vshrl.u32 %v28_v16, 7  ;;  %v34_v21 = vand.u32 127, %v28_v16  ;;  %s120_s23 = scalar_lea.vmem %s78_s1, 16  ;;  %s124_s24 = scalar_lea.vmem %s78_s1, 32 }
  0x15   :  { %92 = vpow2.f32 %v86_v1  ;;  %v45_v4 = vsel %vm44_vm0, 16843009, %v147_v3  ;;  %p121_p8 = scmp.ne.s32.totalorder %s78_s1, %s120_s23  ;;  %p125_p9 = scmp.lt.s32.totalorder %s78_s1, %s78_s1 }
  0x16   :  { %v46_v7 = vunpack.c.0.s8 %v45_v4  ;;  %v35_v22 = vmul.u32 128, %v29_v19  ;;  %p126_p10 = scmp.lt.s32.totalorder %s124_s24, %s120_s23 }
  0x18   :  { %vm47_vm1 = vcmp.ne.s32.totalorder %v46_v7, 0  ;;  %v36_v24 = vadd.s32 %v35_v22, %v34_v21  ;;  %p127_p11 = por %p126_p10, %p125_p9 }
  0x19   :  { %v87_v9 = vsel %vm47_vm1, 1.0, %v148_v8 }
  0x1a   :  { %v51_v10 = vsub.f32 1.0, %v87_v9  ;;  %vm37_vm2 = vcmp.lt.s32.totalorder %v36_v24, 512  ;;  %p128_p12 = pnand %p127_p11, %p121_p8 }
  0x1f   :  { %v93_v5 = vpop.eup %92 }
  0x20   :  { %v41_v6 = vadd.f32 1.0, %v93_v5 }
  0x22   :  { %94 = vrcp.f32 %v41_v6 }
  0x2c   :  { %v95_v11 = vpop.eup %94 }
  0x2d   :  { %v50_v12 = vmul.f32 %v95_v11, %v87_v9  ;;  %v52_v13 = vsub.f32 1.0, %v95_v11 }
  0x2f   :  { %v53_v14 = vmul.f32 %v52_v13, %v51_v10 }
  0x31   :  { %v54_v15 = vadd.f32 %v53_v14, %v50_v12 }
  0x33   :  { %v55_v17 = vmax.f32 %v54_v15, 1e-08 }
  0x35   :  { %v56_v18 = vmin.f32 %v55_v17, 1.0 }
  0x37   :  { %96 = vlog2.f32 %v56_v18  ;;  %v57_v20 = vsub.f32 1.0, %v56_v18 }
  0x39   :  { %v58_v23 = vmul.f32 %v57_v20, %v57_v20 }
  0x3b   :  { %v59_v25 = vsub.f32 0.0, %v58_v23 }
  0x41   :  { %v97_v26 = vpop.eup %96 }
  0x42   :  { %v61_v27 = vmul.f32 0.6931472, %v97_v26 }
  0x44   :  { %v62_v28 = vmul.f32 %v61_v27, %v59_v25 }
  0x46   :  { %v63_v29 = vsel %vm37_vm2, %v62_v28, 0.0 }
  0x47   :  { %v64_v30 = vrot.slane %v63_v29, 4 }
  0x49   :  { %v65_v31 = vadd.f32 %v64_v30, %v63_v29 }
  0x4b   :  { %v66_v32 = vrot.slane %v65_v31, 2 }
  0x4d   :  { %v67_v33 = vadd.f32 %v66_v32, %v65_v31 }
  0x4f   :  { %v68_v34 = vrot.slane %v67_v33, 1 }
  0x51   :  { %v69_v35 = vadd.f32 %v68_v34, %v67_v33 }
  0x53   :  { %70 = vst [vmem:[#allocation5] sm:$0x1] %v69_v35 }
  0x54   :  { %131 = shalt.err (!%p128_p12)
}
  0x55   :  { %s132_s27 = scalar_lea.hbm %s194_s2, 16 }
  0x56   :  { %p133_p13 = scmp.ne.s32.totalorder %s194_s2, %s132_s27  ;;  %p136_p0 = scmp.lt.u32.totalorder %s132_s27, %s194_s2 }
  0x58   :  { %p138_p1 = pnand %p136_p0, %p133_p13 }
  0x5a   :  { %141 = shalt.err (!%p138_p1)
}
  0x5b   :  { %80 = dma.vmem_to_hbm [thread:$0]  %s78_s1, 16, %s194_s2, [#allocation4]  }
  0x5c   :  { %144 = dma.done.wait [#allocation4], 16  }
  0x5d   :  { %145 = vsyncadd [#allocation4], 4294967280 }
  0x5e   :  { %84 = vsyncpa [#allocation3], 1 }
  0x5f   :  { %85 = vsyncpa [#allocation4], 1 }

</bundles_post_ra>
